<compile_context>
chip_gen: v7x
topology: tpu7x:2x2x1
jax: 0.10.0
libtpu: 0.0.40
codegen_flags: <defaults>
</compile_context>

<pallas_src>
import math

import numpy as np
import jax
import jax.numpy as jnp
from jax import lax
from jax.experimental import pallas as pl
from jax.experimental.pallas import tpu as pltpu

EPS = 1e-7
_LANE = 128
_SUB = 8


# ----------------------------------------------------------------------------
# Kernel: per-(batch, anchor-tile) [8,128] partial sums of  weight * (1 - CIoU)
# ----------------------------------------------------------------------------
def _boxloss_kernel(packed_ref, out_ref, acc_ref):
    """packed_ref block: [1, 10, tile_g, 128] (anchors lane-dense, 128 / group)

    rows 0-3 : predicted box  x1, y1, x2, y2
    rows 4-7 : target box     x1, y1, x2, y2
    row  8   : weight = valid_mask * box_norm (0 at invalid / padded anchors)
    row  9   : v = 4/pi^2 * (atan(wp/hp) - atan(wt/ht))^2  (precomputed in XLA)
    """
    a_step = pl.program_id(1)

    @pl.when(a_step == 0)
    def _():
        acc_ref[...] = jnp.zeros_like(acc_ref)

    n_chunks = packed_ref.shape[2] // _SUB  # static; tile_g is a multiple of 8

    def chunk(c, carry):
        s = pl.multiple_of(c * _SUB, _SUB)
        px1 = packed_ref[0, 0, pl.ds(s, _SUB), :]
        py1 = packed_ref[0, 1, pl.ds(s, _SUB), :]
        px2 = packed_ref[0, 2, pl.ds(s, _SUB), :]
        py2 = packed_ref[0, 3, pl.ds(s, _SUB), :]
        tx1 = packed_ref[0, 4, pl.ds(s, _SUB), :]
        ty1 = packed_ref[0, 5, pl.ds(s, _SUB), :]
        tx2 = packed_ref[0, 6, pl.ds(s, _SUB), :]
        ty2 = packed_ref[0, 7, pl.ds(s, _SUB), :]
        w = packed_ref[0, 8, pl.ds(s, _SUB), :]
        v = packed_ref[0, 9, pl.ds(s, _SUB), :]

        # Enclosing-box / center-distance terms first so the raw coordinate
        # vregs die before the iou/alpha tail (keeps vreg pressure low).
        cw = jnp.maximum(px2, tx2) - jnp.minimum(px1, tx1)
        ch = jnp.maximum(py2, ty2) - jnp.minimum(py1, ty1)
        diag = cw * cw + ch * ch + EPS
        cxp = (px2 + px1) * 0.5
        cyp = (py2 + py1) * 0.5
        cxt = (tx2 + tx1) * 0.5
        cyt = (ty2 + ty1) * 0.5
        cent = (cxp - cxt) ** 2 + (cyp - cyt) ** 2

        xi1 = jnp.maximum(px1, tx1)
        yi1 = jnp.maximum(py1, ty1)
        xi2 = jnp.minimum(px2, tx2)
        yi2 = jnp.minimum(py2, ty2)
        inter = jnp.maximum(xi2 - xi1, 0.0) * jnp.maximum(yi2 - yi1, 0.0)
        area_p = (px2 - px1) * (py2 - py1)
        area_t = (tx2 - tx1) * (ty2 - ty1)
        union = area_p + area_t - inter

        # Exact divides for parity with the torch reference (HBM-bound on
        # v5e/v6e, so they are hidden under DMA anyway).
        iou = inter / (union + EPS)
        diou = iou - cent / diag
        alpha = v / (v - iou + 1.0 + EPS)
        ciou = diou - alpha * v

        acc_ref[...] += w * (1.0 - ciou)     # pure VPU add into (8,128) acc
        return carry

    lax.fori_loop(0, n_chunks, chunk, 0, unroll=True)

    @pl.when(a_step == pl.num_programs(1) - 1)
    def _():
        out_ref[0, :, :] = acc_ref[...]      # lane-dense [8,128] store


# ----------------------------------------------------------------------------
# Wrapper glue: sanitize, pack anchors lane-dense, pad, tile, launch.
# ----------------------------------------------------------------------------
def _pack_inputs(predicts_bbox, targets_bbox, valid_masks, box_norm, a_pad):
    B, A, _ = predicts_bbox.shape
    valid = valid_masks.astype(jnp.bool_)
    # Zero all per-anchor data at invalid positions so garbage (NaN/Inf) there
    # cannot poison the dense masked sum (matches torch's boolean gather).
    pb = jnp.where(valid[..., None], predicts_bbox.astype(jnp.float32), 0.0)
    tb = jnp.where(valid[..., None], targets_bbox.astype(jnp.float32), 0.0)
    w = jnp.where(valid, box_norm.astype(jnp.float32), 0.0)

    # TODO(synk): jnp.arctan lowering in Mosaic is not guaranteed, so the CIoU
    # v-term is precomputed here (one fused XLA pass) and shipped as row 9.
    atan_p = jnp.arctan((pb[..., 2] - pb[..., 0]) / (pb[..., 3] - pb[..., 1] + EPS))
    atan_t = jnp.arctan((tb[..., 2] - tb[..., 0]) / (tb[..., 3] - tb[..., 1] + EPS))
    v = (4.0 / (math.pi ** 2)) * (atan_p - atan_t) ** 2

    packed = jnp.concatenate(
        [jnp.transpose(pb, (0, 2, 1)),   # [B, 4, A]
         jnp.transpose(tb, (0, 2, 1)),   # [B, 4, A]
         w[:, None, :],                  # [B, 1, A]
         v[:, None, :]],                 # [B, 1, A]
        axis=1)                          # -> [B, 10, A]
    packed = jnp.pad(packed, ((0, 0), (0, 0), (0, a_pad - A)))
    return packed.reshape(B, 10, a_pad // _LANE, _LANE)


def box_loss(predicts_bbox, targets_bbox, valid_masks, box_norm, cls_norm,
             *, anchors_per_tile=32768):
    """Pallas BoxLoss.forward.

    predicts_bbox, targets_bbox : [B, A, 4] xyxy
    valid_masks                 : [B, A] bool
    box_norm                    : [B, A] (values at invalid anchors are ignored)
    cls_norm                    : scalar
    """
    B, A, _ = predicts_bbox.shape

    # Anchor groups of 128 lanes; pad groups only to a multiple of 8 sublanes.
    g = -(-A // _LANE)
    g8 = -(-g // _SUB) * _SUB
    tile_max = max(_SUB, (anchors_per_tile // _LANE) // _SUB * _SUB)
    if g8 <= tile_max:
        n_tiles = 1                       # one tile per batch (typical YOLO A)
        tile_g = g8
    else:
        # Fallback for huge A: near-even split, padding bounded to <8*n_tiles.
        n_tiles = -(-g8 // tile_max)
        per = -(-g8 // n_tiles)
        tile_g = -(-per // _SUB) * _SUB
    g_pad = n_tiles * tile_g
    a_pad = g_pad * _LANE

    packed = _pack_inputs(predicts_bbox, targets_bbox, valid_masks, box_norm, a_pad)

    in_tile_bytes = 10 * tile_g * _LANE * 4
    vmem_limit = int(min(64 << 20, max(4 << 20, 4 * in_tile_bytes + (2 << 20))))

    cost = pl.CostEstimate(
        flops=45 * B * a_pad,
        transcendentals=0,
        bytes_accessed=int(packed.size) * 4 + B * _SUB * _LANE * 4)

    # [B, 8, 128] partial sums; cross-lane/sublane reduce + /cls_norm in XLA.
    partials = pl.pallas_call(
        _boxloss_kernel,
        out_shape=jax.ShapeDtypeStruct((B, _SUB, _LANE), jnp.float32),
        grid=(B, n_tiles),
        in_specs=[pl.BlockSpec((1, 10, tile_g, _LANE), lambda b, a: (b, 0, a, 0))],
        out_specs=pl.BlockSpec((1, _SUB, _LANE), lambda b, a: (b, 0, 0)),
        scratch_shapes=[pltpu.VMEM((_SUB, _LANE), jnp.float32)],
        compiler_params=pltpu.CompilerParams(
            dimension_semantics=("parallel", "arbitrary"),
            vmem_limit_bytes=vmem_limit),
        cost_estimate=cost,
    )(packed)
    # TODO(synk): if B==1 on v7x, a second "parallel" axis over anchor halves
    # would be needed to keep both TensorCores busy.

    return jnp.sum(partials) / cls_norm


# ----------------------------------------------------------------------------
# Pure-JAX reference (mirrors the torch BoxLoss / calculate_iou math).
# ----------------------------------------------------------------------------
def box_loss_ref(predicts_bbox, targets_bbox, valid_masks, box_norm, cls_norm):
    pb = predicts_bbox.astype(jnp.float32)
    tb = targets_bbox.astype(jnp.float32)
    xi1 = jnp.maximum(pb[..., 0], tb[..., 0])
    yi1 = jnp.maximum(pb[..., 1], tb[..., 1])
    xi2 = jnp.minimum(pb[..., 2], tb[..., 2])
    yi2 = jnp.minimum(pb[..., 3], tb[..., 3])
    inter = jnp.maximum(xi2 - xi1, 0.0) * jnp.maximum(yi2 - yi1, 0.0)
    area_p = (pb[..., 2] - pb[..., 0]) * (pb[..., 3] - pb[..., 1])
    area_t = (tb[..., 2] - tb[..., 0]) * (tb[..., 3] - tb[..., 1])
    union = area_p + area_t - inter
    iou = inter / (union + EPS)
    cxp = (pb[..., 2] + pb[..., 0]) * 0.5
    cyp = (pb[..., 3] + pb[..., 1]) * 0.5
    cxt = (tb[..., 2] + tb[..., 0]) * 0.5
    cyt = (tb[..., 3] + tb[..., 1]) * 0.5
    cent = (cxp - cxt) ** 2 + (cyp - cyt) ** 2
    cw = jnp.maximum(pb[..., 2], tb[..., 2]) - jnp.minimum(pb[..., 0], tb[..., 0])
    ch = jnp.maximum(pb[..., 3], tb[..., 3]) - jnp.minimum(pb[..., 1], tb[..., 1])
    diag = cw * cw + ch * ch + EPS
    diou = iou - cent / diag
    arct = (jnp.arctan((pb[..., 2] - pb[..., 0]) / (pb[..., 3] - pb[..., 1] + EPS))
            - jnp.arctan((tb[..., 2] - tb[..., 0]) / (tb[..., 3] - tb[..., 1] + EPS)))
    v = (4.0 / (math.pi ** 2)) * arct * arct
    alpha = v / (v - iou + 1.0 + EPS)
    ciou = diou - alpha * v
    # Gather semantics: only valid anchors contribute (NaN at invalid ignored).
    loss = jnp.where(valid_masks.astype(jnp.bool_),
                     (1.0 - ciou) * box_norm.astype(jnp.float32), 0.0)
    return jnp.sum(loss) / cls_norm


# ----------------------------------------------------------------------------
# Self-test
# ----------------------------------------------------------------------------
def _rand_case(key, B, A, poison_invalid=False):
    k1, k2, k3, k4 = jax.random.split(key, 4)

    def rand_boxes(k):
        ka, kb = jax.random.split(k)
        xy1 = jax.random.uniform(ka, (B, A, 2), minval=0.0, maxval=40.0)
        wh = jax.random.uniform(kb, (B, A, 2), minval=2.0, maxval=30.0)
        return jnp.concatenate([xy1, xy1 + wh], axis=-1)

    pred = rand_boxes(k1)
    tgt = rand_boxes(k2)
    valid = jax.random.uniform(k3, (B, A)) > 0.5
    box_norm = jax.random.uniform(k4, (B, A), minval=0.1, maxval=2.0)
    if poison_invalid:
        # Garbage at invalid anchors must not leak into the loss.
        poison = jnp.where(valid[..., None], 1.0, jnp.nan)
        pred = pred * poison
        tgt = tgt * poison
        box_norm = jnp.where(valid, box_norm, jnp.nan)
    cls_norm = jnp.maximum(jnp.sum(jnp.where(valid, box_norm, 0.0)), 1.0)
    return pred, tgt, valid, box_norm, cls_norm


def _check(name, args, **kw):
    loss = jax.block_until_ready(box_loss(*args, **kw))
    ref = box_loss_ref(*args)
    assert bool(jnp.isfinite(loss)), f"{name}: non-finite loss {loss}"
    assert np.allclose(np.asarray(loss), np.asarray(ref), rtol=1e-4, atol=1e-4), (
        name, float(loss), float(ref))


if __name__ == "__main__":
    key = jax.random.PRNGKey(0)
    ka, kb = jax.random.split(key)

    # Case 1: small, non-multiple-of-128 anchor count, NaN garbage at invalid
    # anchors (single anchor tile, single sublane chunk).
    case1 = _rand_case(ka, B=2, A=300, poison_invalid=True)
    _check("case1", case1)

    # Case 2: larger anchor count -> multiple sublane chunks in one tile.
    case2 = _rand_case(kb, B=1, A=1500)
    _check("case2", case2)

    # Case 3: same data, forced multi-tile path (accumulator across a-steps).
    _check("case3", case2, anchors_per_tile=1024)

    print("KERNEL_OK")
</pallas_src>

<mosaic_0001>
module attributes {stable_mosaic.version = 11 : i64} {
  func.func @_boxloss_kernel(%arg0: i32, %arg1: i32, %arg2: memref<1x10x8x128xf32, #tpu.memory_space<vmem>>, %arg3: memref<1x8x128xf32, #tpu.memory_space<vmem>>, %arg4: memref<8x128xf32, #tpu.memory_space<vmem>>) attributes {dimension_semantics = [#tpu.dimension_semantics<parallel>, #tpu.dimension_semantics<arbitrary>], iteration_bounds = array<i64: 2, 1>, scalar_prefetch = 0 : i64, scratch_operands = 1 : i64, tpu.core_type = #tpu.core_type<tc>, window_params = [{transform_indices = @transform_0, window_bounds = array<i64: 1, 10, 8, 128>}, {transform_indices = @transform_1, window_bounds = array<i64: 1, 8, 128>}]} {
    %c0_i32 = arith.constant 0 : i32
    %0 = arith.cmpi eq, %arg1, %c0_i32 : i32
    %1 = arith.extui %0 : i1 to i32
    %c0_i32_0 = arith.constant 0 : i32
    %2 = arith.cmpi ne, %1, %c0_i32_0 : i32
    scf.if %2 {
      %cst_38 = arith.constant 0.000000e+00 : f32
      %104 = vector.broadcast %cst_38 : f32 to vector<8x128xf32>
      %c0_39 = arith.constant 0 : index
      %c0_40 = arith.constant 0 : index
      %105 = vector.load %arg4[%c0_39, %c0_40] : memref<8x128xf32, #tpu.memory_space<vmem>>, vector<8x128xf32>
      tpu.vector_store %arg4[%c0_39, %c0_40], %104 {strides = array<i32>} : memref<8x128xf32, #tpu.memory_space<vmem>>, vector<8x128xf32>,
    } else {
    }
    %c0_i32_1 = arith.constant 0 : i32
    %c8_i32 = arith.constant 8 : i32
    %3 = arith.muli %c0_i32_1, %c8_i32 : i32
    %4 = tpu.assume_multiple %3, 8 : i32
    %c0 = arith.constant 0 : index
    %c0_2 = arith.constant 0 : index
    %5 = arith.index_cast %4 : i32 to index
    %c0_3 = arith.constant 0 : index
    %6 = vector.load %arg2[%c0, %c0_2, %5, %c0_3] : memref<1x10x8x128xf32, #tpu.memory_space<vmem>>, vector<1x1x8x128xf32>
    %7 = vector.shape_cast %6 : vector<1x1x8x128xf32> to vector<8x128xf32>
    %c0_4 = arith.constant 0 : index
    %c1 = arith.constant 1 : index
    %8 = arith.index_cast %4 : i32 to index
    %c0_5 = arith.constant 0 : index
    %9 = vector.load %arg2[%c0_4, %c1, %8, %c0_5] : memref<1x10x8x128xf32, #tpu.memory_space<vmem>>, vector<1x1x8x128xf32>
    %10 = vector.shape_cast %9 : vector<1x1x8x128xf32> to vector<8x128xf32>
    %c0_6 = arith.constant 0 : index
    %c2 = arith.constant 2 : index
    %11 = arith.index_cast %4 : i32 to index
    %c0_7 = arith.constant 0 : index
    %12 = vector.load %arg2[%c0_6, %c2, %11, %c0_7] : memref<1x10x8x128xf32, #tpu.memory_space<vmem>>, vector<1x1x8x128xf32>
    %13 = vector.shape_cast %12 : vector<1x1x8x128xf32> to vector<8x128xf32>
    %c0_8 = arith.constant 0 : index
    %c3 = arith.constant 3 : index
    %14 = arith.index_cast %4 : i32 to index
    %c0_9 = arith.constant 0 : index
    %15 = vector.load %arg2[%c0_8, %c3, %14, %c0_9] : memref<1x10x8x128xf32, #tpu.memory_space<vmem>>, vector<1x1x8x128xf32>
    %16 = vector.shape_cast %15 : vector<1x1x8x128xf32> to vector<8x128xf32>
    %c0_10 = arith.constant 0 : index
    %c4 = arith.constant 4 : index
    %17 = arith.index_cast %4 : i32 to index
    %c0_11 = arith.constant 0 : index
    %18 = vector.load %arg2[%c0_10, %c4, %17, %c0_11] : memref<1x10x8x128xf32, #tpu.memory_space<vmem>>, vector<1x1x8x128xf32>
    %19 = vector.shape_cast %18 : vector<1x1x8x128xf32> to vector<8x128xf32>
    %c0_12 = arith.constant 0 : index
    %c5 = arith.constant 5 : index
    %20 = arith.index_cast %4 : i32 to index
    %c0_13 = arith.constant 0 : index
    %21 = vector.load %arg2[%c0_12, %c5, %20, %c0_13] : memref<1x10x8x128xf32, #tpu.memory_space<vmem>>, vector<1x1x8x128xf32>
    %22 = vector.shape_cast %21 : vector<1x1x8x128xf32> to vector<8x128xf32>
    %c0_14 = arith.constant 0 : index
    %c6 = arith.constant 6 : index
    %23 = arith.index_cast %4 : i32 to index
    %c0_15 = arith.constant 0 : index
    %24 = vector.load %arg2[%c0_14, %c6, %23, %c0_15] : memref<1x10x8x128xf32, #tpu.memory_space<vmem>>, vector<1x1x8x128xf32>
    %25 = vector.shape_cast %24 : vector<1x1x8x128xf32> to vector<8x128xf32>
    %c0_16 = arith.constant 0 : index
    %c7 = arith.constant 7 : index
    %26 = arith.index_cast %4 : i32 to index
    %c0_17 = arith.constant 0 : index
    %27 = vector.load %arg2[%c0_16, %c7, %26, %c0_17] : memref<1x10x8x128xf32, #tpu.memory_space<vmem>>, vector<1x1x8x128xf32>
    %28 = vector.shape_cast %27 : vector<1x1x8x128xf32> to vector<8x128xf32>
    %c0_18 = arith.constant 0 : index
    %c8 = arith.constant 8 : index
    %29 = arith.index_cast %4 : i32 to index
    %c0_19 = arith.constant 0 : index
    %30 = vector.load %arg2[%c0_18, %c8, %29, %c0_19] : memref<1x10x8x128xf32, #tpu.memory_space<vmem>>, vector<1x1x8x128xf32>
    %31 = vector.shape_cast %30 : vector<1x1x8x128xf32> to vector<8x128xf32>
    %c0_20 = arith.constant 0 : index
    %c9 = arith.constant 9 : index
    %32 = arith.index_cast %4 : i32 to index
    %c0_21 = arith.constant 0 : index
    %33 = vector.load %arg2[%c0_20, %c9, %32, %c0_21] : memref<1x10x8x128xf32, #tpu.memory_space<vmem>>, vector<1x1x8x128xf32>
    %34 = vector.shape_cast %33 : vector<1x1x8x128xf32> to vector<8x128xf32>
    %35 = arith.maximumf %13, %25 : vector<8x128xf32>
    %36 = arith.minimumf %7, %19 : vector<8x128xf32>
    %37 = arith.subf %35, %36 : vector<8x128xf32>
    %38 = arith.maximumf %16, %28 : vector<8x128xf32>
    %39 = arith.minimumf %10, %22 : vector<8x128xf32>
    %40 = arith.subf %38, %39 : vector<8x128xf32>
    %41 = arith.mulf %37, %37 : vector<8x128xf32>
    %42 = arith.mulf %40, %40 : vector<8x128xf32>
    %43 = arith.addf %41, %42 : vector<8x128xf32>
    %cst = arith.constant 1.000000e-07 : f32
    %44 = vector.broadcast %cst : f32 to vector<8x128xf32>
    %45 = arith.addf %43, %44 : vector<8x128xf32>
    %46 = arith.addf %13, %7 : vector<8x128xf32>
    %cst_22 = arith.constant 5.000000e-01 : f32
    %47 = vector.broadcast %cst_22 : f32 to vector<8x128xf32>
    %48 = arith.mulf %46, %47 : vector<8x128xf32>
    %49 = arith.addf %16, %10 : vector<8x128xf32>
    %cst_23 = arith.constant 5.000000e-01 : f32
    %50 = vector.broadcast %cst_23 : f32 to vector<8x128xf32>
    %51 = arith.mulf %49, %50 : vector<8x128xf32>
    %52 = arith.addf %25, %19 : vector<8x128xf32>
    %cst_24 = arith.constant 5.000000e-01 : f32
    %53 = vector.broadcast %cst_24 : f32 to vector<8x128xf32>
    %54 = arith.mulf %52, %53 : vector<8x128xf32>
    %55 = arith.addf %28, %22 : vector<8x128xf32>
    %cst_25 = arith.constant 5.000000e-01 : f32
    %56 = vector.broadcast %cst_25 : f32 to vector<8x128xf32>
    %57 = arith.mulf %55, %56 : vector<8x128xf32>
    %58 = arith.subf %48, %54 : vector<8x128xf32>
    %59 = arith.mulf %58, %58 : vector<8x128xf32>
    %60 = arith.subf %51, %57 : vector<8x128xf32>
    %61 = arith.mulf %60, %60 : vector<8x128xf32>
    %62 = arith.addf %59, %61 : vector<8x128xf32>
    %63 = arith.maximumf %7, %19 : vector<8x128xf32>
    %64 = arith.maximumf %10, %22 : vector<8x128xf32>
    %65 = arith.minimumf %13, %25 : vector<8x128xf32>
    %66 = arith.minimumf %16, %28 : vector<8x128xf32>
    %67 = arith.subf %65, %63 : vector<8x128xf32>
    %cst_26 = arith.constant 0.000000e+00 : f32
    %68 = vector.broadcast %cst_26 : f32 to vector<8x128xf32>
    %69 = arith.maximumf %67, %68 : vector<8x128xf32>
    %70 = arith.subf %66, %64 : vector<8x128xf32>
    %cst_27 = arith.constant 0.000000e+00 : f32
    %71 = vector.broadcast %cst_27 : f32 to vector<8x128xf32>
    %72 = arith.maximumf %70, %71 : vector<8x128xf32>
    %73 = arith.mulf %69, %72 : vector<8x128xf32>
    %74 = arith.subf %13, %7 : vector<8x128xf32>
    %75 = arith.subf %16, %10 : vector<8x128xf32>
    %76 = arith.mulf %74, %75 : vector<8x128xf32>
    %77 = arith.subf %25, %19 : vector<8x128xf32>
    %78 = arith.subf %28, %22 : vector<8x128xf32>
    %79 = arith.mulf %77, %78 : vector<8x128xf32>
    %80 = arith.addf %76, %79 : vector<8x128xf32>
    %81 = arith.subf %80, %73 : vector<8x128xf32>
    %cst_28 = arith.constant 1.000000e-07 : f32
    %82 = vector.broadcast %cst_28 : f32 to vector<8x128xf32>
    %83 = arith.addf %81, %82 : vector<8x128xf32>
    %84 = arith.divf %73, %83 : vector<8x128xf32>
    %85 = arith.divf %62, %45 : vector<8x128xf32>
    %86 = arith.subf %84, %85 : vector<8x128xf32>
    %87 = arith.subf %34, %84 : vector<8x128xf32>
    %cst_29 = arith.constant 1.000000e+00 : f32
    %88 = vector.broadcast %cst_29 : f32 to vector<8x128xf32>
    %89 = arith.addf %87, %88 : vector<8x128xf32>
    %cst_30 = arith.constant 1.000000e-07 : f32
    %90 = vector.broadcast %cst_30 : f32 to vector<8x128xf32>
    %91 = arith.addf %89, %90 : vector<8x128xf32>
    %92 = arith.divf %34, %91 : vector<8x128xf32>
    %93 = arith.mulf %92, %34 : vector<8x128xf32>
    %94 = arith.subf %86, %93 : vector<8x128xf32>
    %c0_31 = arith.constant 0 : index
    %c0_32 = arith.constant 0 : index
    %95 = vector.load %arg4[%c0_31, %c0_32] : memref<8x128xf32, #tpu.memory_space<vmem>>, vector<8x128xf32>
    %cst_33 = arith.constant 1.000000e+00 : f32
    %96 = vector.broadcast %cst_33 : f32 to vector<8x128xf32>
    %97 = arith.subf %96, %94 : vector<8x128xf32>
    %98 = arith.mulf %31, %97 : vector<8x128xf32>
    %99 = arith.addf %95, %98 : vector<8x128xf32>
    %c0_34 = arith.constant 0 : index
    %c0_35 = arith.constant 0 : index
    %100 = vector.load %arg4[%c0_34, %c0_35] : memref<8x128xf32, #tpu.memory_space<vmem>>, vector<8x128xf32>
    tpu.vector_store %arg4[%c0_34, %c0_35], %99 {strides = array<i32>} : memref<8x128xf32, #tpu.memory_space<vmem>>, vector<8x128xf32>,
    %c1_i32 = arith.constant 1 : i32
    %c0_i32_36 = arith.constant 0 : i32
    %101 = arith.cmpi eq, %arg1, %c0_i32_36 : i32
    %102 = arith.extui %101 : i1 to i32
    %c0_i32_37 = arith.constant 0 : i32
    %103 = arith.cmpi ne, %102, %c0_i32_37 : i32
    scf.if %103 {
      %c0_38 = arith.constant 0 : index
      %c0_39 = arith.constant 0 : index
      %104 = vector.load %arg4[%c0_38, %c0_39] : memref<8x128xf32, #tpu.memory_space<vmem>>, vector<8x128xf32>
      %c0_40 = arith.constant 0 : index
      %c0_41 = arith.constant 0 : index
      %c0_42 = arith.constant 0 : index
      %105 = vector.load %arg3[%c0_40, %c0_41, %c0_42] : memref<1x8x128xf32, #tpu.memory_space<vmem>>, vector<1x8x128xf32>
      %106 = vector.shape_cast %105 : vector<1x8x128xf32> to vector<8x128xf32>
      %107 = vector.shape_cast %104 : vector<8x128xf32> to vector<1x8x128xf32>
      tpu.vector_store %arg3[%c0_40, %c0_41, %c0_42], %107 {strides = array<i32>} : memref<1x8x128xf32, #tpu.memory_space<vmem>>, vector<1x8x128xf32>,
    } else {
    }
    return
  }
  func.func @transform_0(%arg0: i32, %arg1: i32) -> (i32, i32, i32, i32) {
    %c0_i32 = arith.constant 0 : i32
    %c0_i32_0 = arith.constant 0 : i32
    %c0_i32_1 = arith.constant 0 : i32
    return %arg0, %c0_i32, %arg1, %c0_i32_0 : i32, i32, i32, i32
  }
  func.func @transform_1(%arg0: i32, %arg1: i32) -> (i32, i32, i32) {
    %c0_i32 = arith.constant 0 : i32
    %c0_i32_0 = arith.constant 0 : i32
    %c0_i32_1 = arith.constant 0 : i32
    return %arg0, %c0_i32, %c0_i32_0 : i32, i32, i32
  }
}

</mosaic_0001>

<bundles_post_ra>
// kernel: tpu_custom_call.1
= control target key start
LH: loop header
LB: loop body
LE: loop exit
PB: predicated region body
PF: predicated region fallthrough
CT: control target
= control target key end

     0   :  { %6 = vsyncpa [#allocation4], 0  ;;  %s756_s0 = inlined_call_operand.hbm [shape: f32[2,10,8,128], index: 0, kind: input, shape index: {}]   ;;  %s757_s1 = inlined_call_operand.hbm [shape: f32[2,8,128], index: 1, kind: output, shape index: {}]  }
   0x1   :  { %8 = vsyncpa [#allocation4 + $0x1], 0 }
   0x2   :  { %9 = vsyncpa [#allocation5], 0 }
   0x3   :  { %11 = vsyncpa [#allocation5 + $0x1], 0  ;;  %s570_s6 = smov 0   ;;  %s572_s7 = smov 0  }
   0x4   :  { %s574_s8 = smov 0   ;;  %s576_s9 = smov 0  }
   0x5   :  { %s578_s10 = smov 0   ;;  %s580_s11 = smov 0  }
   0x6 LB: > { %s349_s12 = sadd.s32 4294967295, %s554_s11   ;;  %s350_s13 = sadd.s32 4294967294, %s554_s11   ;;  %s554_s11 = sphi %s580_s11, %s17_s11   ;;  %s550_s10 = sphi %s578_s10, %s772_s10   ;;  %s546_s9 = sphi %s576_s9, %s771_s9   ;;  %s542_s8 = sphi %s574_s8, %s770_s8   ;;  %s538_s7 = sphi %s572_s7, %s769_s7   ;;  %s534_s6 = sphi %s570_s6, %s768_s6  }
   0x7   : > { %s29_s14 = sadd.s32 1, %s550_s10  ;;  %s38_s15 = sadd.s32 1, %s542_s8 }
   0x8   : > { %p31_p0 = scmp.ge.s32.totalorder %s29_s14, 2  ;;  %p45_p1 = scmp.ne.s32.totalorder %s542_s8, %s538_s7 }
   0x9   : > { %p46_p2 = scmp.eq.s32.totalorder %s554_s11, 0  ;;  %p51_p3 = scmp.ne.s32.totalorder %s538_s7, %s534_s6 }
   0xa   : > { %s774_s14 = smov (%p31_p0, %s29_s14), 0  ;;  %p52_p5 = scmp.eq.s32.totalorder %s349_s12, 0 }
   0xb   : > { %p611_p4 = por %p46_p2, %p45_p1  ;;  %s33_s17 = ssub.s32 %s550_s10, %s774_s14 }
   0xc   : > { %p75_p6 = scmp.eq.s32.totalorder %s349_s12, 1  ;;  %p36_p7 = scmp.eq.s32.totalorder %s33_s17, 0 }
   0xd   : > { %p617_p8 = por %p52_p5, %p51_p3  ;;  %p81_p10 = scmp.eq.s32.totalorder %s350_s13, 1 }
   0xe   : > { %p621_p9 = por %p75_p6, %p45_p1  ;;  %p384_p13 = scmp.lt.s32.totalorder %s554_s11, 2 }
   0xf   : > { %s626_s20 = scalar_select %p36_p7, %s542_s8, %s38_s15  }
  0x10   : > { %s761_s19 = scalar_select %p621_p9, 1, 0 }
  0x11   : > { %p628_p11 = por %p81_p10, %p51_p3  ;;  %s101_s22 = sand.u32 1, %s542_s8  }
  0x12   : > { %s369_s23 = smul.u32 80, %s101_s22  ;;  %p638_p0 = pnand %p384_p13, %p611_p4 }
  0x13   : > { %s762_s21 = scalar_select %p628_p11, 1, 0 }
  0x14   : > { %s370_s24 = smul.u32 1280, %s550_s10  ;;  %s105_s29 = scalar_lea.vmem [#allocation3], %s369_s23 }
  0x15   : > { %s113_s30 = sshll.u32 %s105_s29, 4  ;;  %s650_s2 = scalar_lea.sflag [#allocation4], %s101_s22  ;;  %s647_s30 = int_to_ptr.vmem [resolvable:$true] %s113_s30 }
  0x16   : > { %s645_s28 = scalar_lea.hbm %s756_s0, %s370_s24  ;;  %p444_p3 = pneg %p638_p0 }
  0x17   : > { %s442_s3 = scalar_lea.hbm %s645_s28, 1280  ;;  %s447_s12 = scalar_lea.hbm %s756_s0, 2560 }
  0x18   : > { %p443_p2 = scmp.ne.s32.totalorder %s645_s28, %s442_s3  ;;  %p448_p6 = scmp.lt.u32.totalorder %s645_s28, %s756_s0 }
  0x19   : > { %p449_p7 = scmp.lt.u32.totalorder %s447_s12, %s442_s3  ;;  %p451_p13 = scmp.lt.u32.totalorder %s442_s3, %s645_s28 }
  0x1a   : > { %p445_p4 = pnand %p444_p3, %p443_p2 }
  0x1b   : > { %p450_p10 = por %p449_p7, %p448_p6 }
  0x1c   : > { %p446_p5 = pneg %p445_p4 }
  0x1d   : > { %p452_p12 = por %p451_p13, %p450_p10 }
  0x1f   : > { %p453_p1 = pnand %p452_p12, %p446_p5 }
  0x21   : > { %456 = shalt.err (!%p453_p1)
}
  0x22   : > { %s457_s16 = scalar_lea.vmem %s647_s30, 1280  ;;  %s556_s17 = smov [#allocation3]  }
  0x23   : > { %p458_p2 = scmp.ne.s32.totalorder %s647_s30, %s457_s16  ;;  %s462_s22 = sshll.u32 %s556_s17, 4  ;;  %s463_s22 = int_to_ptr.vmem [resolvable:$false] %s462_s22 }
  0x24   : > { %s464_s23 = scalar_lea.vmem %s463_s22, 2560  ;;  %p465_p9 = scmp.lt.s32.totalorder %s647_s30, %s463_s22 }
  0x25   : > { %p460_p4 = pnand %p458_p2, %p444_p3  ;;  %p466_p6 = scmp.lt.s32.totalorder %s464_s23, %s457_s16 }
  0x27   : > { %p461_p11 = pneg %p460_p4  ;;  %p467_p7 = por %p466_p6, %p465_p9 }
  0x29   : > { %p468_p10 = pnand %p467_p7, %p461_p11 }
  0x2b   : > { %471 = shalt.err (!%p468_p10)
}
  0x2c   : > { %s557_s24 = smov 128   ;;  %s558_s26 = smov 8  }
  0x2d   : > { %379 = dma.hbm_to_vmem [thread:$0]  (!%p638_p0), %s645_s28, 1280, %s647_s30, %s650_s2, %s557_s24, %s557_s24, %s558_s26  }
  0x2e   : > { %p121_p12 = scmp.lt.s32.totalorder %s554_s11, 3  ;;  %p764_p1 = scmp.ge.s32.totalorder %s554_s11, 1 }
  0x30   : > { %p122_p3 = pnand %p764_p1, %p121_p12 }
  0x31   : > { %s682_s27 = sand.u32 (!%p122_p3), 1, %s538_s7  }
  0x32   : > { %125 = sbr.rel (%p122_p3) target bundleno = 128 (0x80), region = 24  ;;  %s128_s3 = scalar_lea.sflag (!%p122_p3), [#allocation4], %s682_s27 }
  0x33   : > { %s371_s29 = smul.u32 (!%p122_p3), 80, %s682_s27 }
  0x35   : > { %s686_s4 = scalar_lea.vmem (!%p122_p3), [#allocation3], %s371_s29 }
  0x39   : > { %525 = dma.done.wait (%p617_p8), %s128_s3, 1280  }
  0x3a   : > { %527 = vsyncadd (%p617_p8), %s128_s3, 4294966016  ;;  %v155_v0 = vld [vmem:[%s686_s4] sm:$0xff]  ;;  %v356_v1 = vld [vmem:[%s686_s4 + $0x8] sm:$0xff]  ;;  %s355_s18 = sshll.u32 %s682_s27, 3  ;;  %s366_s30 = sshll.u32 %s546_s9, 7 }
  0x3b   : > { %v357_v2 = vld [vmem:[%s686_s4 + $0x10] sm:$0xff]  ;;  %v359_v3 = vld [vmem:[%s686_s4 + $0x20] sm:$0xff]  ;;  %v360_v4 = vld [vmem:[%s686_s4 + $0x28] sm:$0xff]  ;;  %s149_s25 = scalar_lea.vmem [#allocation6], %s355_s18  ;;  %s709_s12 = scalar_lea.hbm %s757_s1, %s366_s30 }
  0x3c   : > { %v358_v5 = vld [vmem:[%s686_s4 + $0x18] sm:$0xff]  ;;  %v361_v6 = vld [vmem:[%s686_s4 + $0x30] sm:$0xff]  ;;  %v206_v8 = vmax.f32 %v155_v0, %v359_v3  ;;  %v207_v9 = vmax.f32 %v356_v1, %v360_v4  ;;  %v215_v11 = vsub.f32 %v357_v2, %v155_v0  ;;  %v184_v21 = vmin.f32 %v155_v0, %v359_v3  ;;  %v364_v41 = vld [vmem:[%s686_s4 + $0x48] sm:$0xff]  ;;  %s260_s28 = sshll.u32 %s149_s25, 4  ;;  %s247_s13 = scalar_lea.sflag [#allocation5], %s682_s27  ;;  %s704_s28 = int_to_ptr.vmem [resolvable:$true] %s260_s28 }
  0x3d   : > { %v362_v7 = vld [vmem:[%s686_s4 + $0x38] sm:$0xff]  ;;  %v208_v10 = vmin.f32 %v357_v2, %v361_v6  ;;  %v216_v14 = vsub.f32 %v358_v5, %v356_v1  ;;  %v218_v15 = vsub.f32 %v361_v6, %v359_v3  ;;  %v183_v23 = vmax.f32 %v357_v2, %v361_v6  ;;  %v363_v62 = vld [vmem:[%s686_s4 + $0x40] sm:$0xff]  ;;  %s472_s15 = scalar_lea.vmem %s704_s28, 128  ;;  %p765_p9 = scmp.ne.s32.totalorder %s761_s19, 0 }
  0x3e   : > { %v209_v12 = vmin.f32 %v358_v5, %v362_v7  ;;  %v219_v19 = vsub.f32 %v362_v7, %v360_v4  ;;  %v186_v24 = vmax.f32 %v358_v5, %v362_v7  ;;  %v187_v25 = vmin.f32 %v356_v1, %v360_v4  ;;  %p473_p8 = scmp.ne.s32.totalorder %s704_s28, %s472_s15  ;;  %s559_s9 = smov [#allocation6]  }
  0x3f   : > { %v210_v13 = vsub.f32 %v208_v10, %v206_v8  ;;  %v217_v18 = vmul.f32 %v216_v14, %v215_v11  ;;  %v185_v29 = vsub.f32 %v183_v23, %v184_v21  ;;  %v193_v35 = vadd.f32 %v357_v2, %v155_v0  ;;  %s476_s16 = sshll.u32 %s559_s9, 4  ;;  %s477_s16 = int_to_ptr.vmem [resolvable:$false] %s476_s16 }
  0x40   : > { %v212_v16 = vsub.f32 %v209_v12, %v207_v9  ;;  %v220_v22 = vmul.f32 %v219_v19, %v218_v15  ;;  %v188_v30 = vsub.f32 %v186_v24, %v187_v25  ;;  %v195_v36 = vadd.f32 %v358_v5, %v356_v1  ;;  %p474_p11 = pnand %p473_p8, %p765_p9  ;;  %s478_s17 = scalar_lea.vmem %s477_s16, 256 }
  0x41   : > { %v211_v17 = vmax.f32 %v210_v13, 0.0  ;;  %v189_v32 = vmul.f32 %v185_v29, %v185_v29  ;;  %v197_v37 = vadd.f32 %v361_v6, %v359_v3  ;;  %v199_v38 = vadd.f32 %v362_v7, %v360_v4  ;;  %p479_p5 = scmp.lt.s32.totalorder %s704_s28, %s477_s16  ;;  %p480_p13 = scmp.lt.s32.totalorder %s478_s17, %s472_s15 }
  0x42   : > { %v213_v20 = vmax.f32 %v212_v16, 0.0  ;;  %v221_v27 = vadd.f32 %v220_v22, %v217_v18  ;;  %v190_v33 = vmul.f32 %v188_v30, %v188_v30  ;;  %v194_v42 = vmul.f32 0.5, %v193_v35  ;;  %p475_p0 = pneg %p474_p11 }
  0x43   : > { %v196_v43 = vmul.f32 0.5, %v195_v36  ;;  %v198_v44 = vmul.f32 0.5, %v197_v37  ;;  %v200_v45 = vmul.f32 0.5, %v199_v38  ;;  %p481_p2 = por %p480_p13, %p479_p5 }
  0x44   : > { %v214_v26 = vmul.f32 %v213_v20, %v211_v17  ;;  %v191_v34 = vadd.f32 %v190_v33, %v189_v32 }
  0x45   : > { %v201_v48 = vsub.f32 %v194_v42, %v198_v44  ;;  %v203_v49 = vsub.f32 %v196_v43, %v200_v45  ;;  %p482_p4 = pnand %p481_p2, %p475_p0 }
  0x46   : > { %v222_v28 = vsub.f32 %v221_v27, %v214_v26  ;;  %v192_v39 = vadd.f32 1e-07, %v191_v34 }
  0x47   : > { %v202_v52 = vmul.f32 %v201_v48, %v201_v48  ;;  %v204_v53 = vmul.f32 %v203_v49, %v203_v49 }
  0x48   : > { %v223_v31 = vadd.f32 1e-07, %v222_v28 }
  0x49   : > { %v205_v54 = vadd.f32 %v204_v53, %v202_v52 }
  0x4a   : > { %436 = vrcp.f32 %v223_v31 }
  0x4b   : > { %438 = vrcp.f32 %v192_v39 }
  0x54   : > { %v437_v40 = vpop.eup %436 }
  0x55   : > { %v225_v46 = vmul.f32 %v437_v40, %v214_v26  ;;  %v439_v55 = vpop.eup %438 }
  0x56   : > { %v227_v56 = vmul.f32 %v439_v55, %v205_v54 }
  0x57   : > { %v229_v47 = vsub.f32 %v364_v41, %v225_v46 }
  0x58   : > { %v228_v58 = vsub.f32 %v225_v46, %v227_v56 }
  0x59   : > { %v230_v50 = vadd.f32 1.0, %v229_v47 }
  0x5b   : > { %v231_v51 = vadd.f32 1e-07, %v230_v50 }
  0x5d   : > { %440 = vrcp.f32 %v231_v51 }
  0x67   : > { %v441_v57 = vpop.eup %440 }
  0x68   : > { %v233_v59 = vmul.f32 %v441_v57, %v364_v41 }
  0x6a   : > { %v234_v60 = vmul.f32 %v364_v41, %v233_v59 }
  0x6c   : > { %v235_v61 = vsub.f32 %v228_v58, %v234_v60 }
  0x6e   : > { %v237_v63 = vsub.f32 1.0, %v235_v61 }
  0x70   : > { %v238_v0 = vmul.f32 %v363_v62, %v237_v63 }
  0x72   : > { %245 = vst [vmem:[%s149_s25] sm:$0xff] %v238_v0 }
  0x73   : > { %485 = shalt.err (!%p482_p4)
}
  0x74   : > { %s486_s22 = scalar_lea.hbm %s709_s12, 128  ;;  %s490_s26 = scalar_lea.hbm %s757_s1, 256 }
  0x75   : > { %p487_p6 = scmp.ne.s32.totalorder %s709_s12, %s486_s22  ;;  %p491_p12 = scmp.lt.u32.totalorder %s709_s12, %s757_s1 }
  0x76   : > { %p492_p1 = scmp.lt.u32.totalorder %s490_s26, %s486_s22  ;;  %p494_p8 = scmp.lt.u32.totalorder %s486_s22, %s709_s12 }
  0x77   : > { %p488_p7 = pnand %p487_p6, %p765_p9 }
  0x78   : > { %p493_p3 = por %p492_p1, %p491_p12 }
  0x79   : > { %p489_p10 = pneg %p488_p7 }
  0x7a   : > { %p495_p11 = por %p494_p8, %p493_p3 }
  0x7c   : > { %p496_p0 = pnand %p495_p11, %p489_p10 }
  0x7e   : > { %499 = shalt.err (!%p496_p0)
}
  0x7f   : > { %374 = dma.vmem_to_hbm [thread:$0]  (%p765_p9), %s704_s28, 128, %s709_s12, %s247_s13  }
  0x80 PF: > { %s272_s3 = sand.u32 1, %s534_s6   ;;  %p766_p5 = scmp.ne.s32.totalorder %s762_s21, 0 }
  0x81   : > { %p767_p13 = scmp.ge.s32.totalorder %s554_s11, 2  ;;  %s273_s4 = scalar_lea.sflag [#allocation5], %s272_s3 }
  0x83   : > { %p381_p2 = pnand %p767_p13, %p766_p5 }
  0x85   : > { %529 = dma.done.wait (!%p381_p2), %s273_s4, 128  }
  0x86   : > { %531 = vsyncadd (!%p381_p2), %s273_s4, 4294967168  ;;  %s17_s11 = sadd.s32 1, %s554_s11   ;;  %s768_s6 = smov %s538_s7 }
  0x87   : > { %p14_p4 = scmp.ge.s32.totalorder %s17_s11, 4   ;;  %s769_s7 = smov %s542_s8 }
  0x88   : > { %s770_s8 = smov %s626_s20  ;;  %s771_s9 = smov %s550_s10 }
  0x89   : > { %s772_s10 = smov %s774_s14  ;;  %16 = sbr.rel (!%p14_p4) target bundleno = 6 (0x6), region = 86 }
  0x90   :  { %278 = vsyncpa [#allocation4], 1 }
  0x91   :  { %280 = vsyncpa [#allocation4 + $0x1], 1 }
  0x92   :  { %281 = vsyncpa [#allocation5], 1 }
  0x93   :  { %283 = vsyncpa [#allocation5 + $0x1], 1 }

</bundles_post_ra>
